<compile_context>
chip_gen: v7x
topology: tpu7x:2x2x1
jax: 0.10.0
libtpu: 0.0.40
codegen_flags: <defaults>
</compile_context>

<pallas_src>
import functools

import jax
import jax.numpy as jnp
from jax.experimental import pallas as pl
from jax.experimental.pallas import tpu as pltpu


def _round_up(x, m):
    return ((x + m - 1) // m) * m


def dqn_kernel(x_ref, w1_ref, b1_ref, w2_ref, b2_ref,
               w3_ref, b3_ref, w4_ref, b4_ref, out_ref):
    """relu(x@W1+b1) -> relu(.@W2+b2) -> relu(.@W3+b3) -> .@W4+b4.

    Layer 1 on the VPU in f32; layers 2-4 on the MXU with bf16 inputs and f32
    accumulation; all elementwise (bias/ReLU) math in f32.
    """
    bf16 = jnp.bfloat16
    x = x_ref[...]            # (TB, IN) f32, IN is tiny (4 for CartPole)
    w1 = w1_ref[...]          # (IN, HP) f32

    # Layer 1: K = IN is far too shallow for the MXU -> unrolled VPU broadcast-FMAs.
    h = b1_ref[...]                              # (1, HP); broadcasts on first add
    for k in range(x.shape[1]):                  # static unroll over input features
        h = h + x[:, k:k + 1] * w1[k:k + 1, :]
    h = jnp.maximum(h, 0.0)                      # (TB, HP) f32

    # Layers 2/3: 128x128 bf16 MXU matmuls, f32 accumulate, f32 bias/ReLU.
    h = jnp.dot(h.astype(bf16), w2_ref[...],
                preferred_element_type=jnp.float32) + b2_ref[...]
    h = jnp.maximum(h, 0.0)
    h = jnp.dot(h.astype(bf16), w3_ref[...],
                preferred_element_type=jnp.float32) + b3_ref[...]
    h = jnp.maximum(h, 0.0)

    # Layer 4: compute against the lane-padded W4, then write only the true
    # out_size columns (masked vst is far cheaper than a 128-lane padded writeback).
    out = jnp.dot(h.astype(bf16), w4_ref[...],
                  preferred_element_type=jnp.float32)      # (TB, OP) f32
    n_out = out_ref.shape[1]
    out_ref[...] = (out[:, :n_out] + b4_ref[...]).astype(out_ref.dtype)


def prepare_dqn_params(params):
    """Pad / cast parameters once per parameter update (hoisted out of forward).

    Logical params: w* of shape (in, out) f32, b* of shape (1, out) f32.
    Returns padded params: w1/b1 f32 (VPU path), w2/w3/w4 bf16 (MXU path),
    b2/b3 f32 padded, b4 f32 at true out_size.
    """
    f32, bf16 = jnp.float32, jnp.bfloat16
    in_size, h_size = params["w1"].shape
    out_size = params["w4"].shape[1]
    HP = _round_up(h_size, 128)
    OP = _round_up(out_size, 128)

    return {
        "w1": jnp.zeros((in_size, HP), f32).at[:, :h_size].set(params["w1"].astype(f32)),
        "b1": jnp.zeros((1, HP), f32).at[:, :h_size].set(params["b1"].astype(f32)),
        "w2": jnp.zeros((HP, HP), bf16).at[:h_size, :h_size].set(params["w2"].astype(bf16)),
        "b2": jnp.zeros((1, HP), f32).at[:, :h_size].set(params["b2"].astype(f32)),
        "w3": jnp.zeros((HP, HP), bf16).at[:h_size, :h_size].set(params["w3"].astype(bf16)),
        "b3": jnp.zeros((1, HP), f32).at[:, :h_size].set(params["b3"].astype(f32)),
        "w4": jnp.zeros((HP, OP), bf16).at[:h_size, :out_size].set(params["w4"].astype(bf16)),
        "b4": params["b4"].astype(f32),           # (1, out_size) — true width
    }


def dqn_forward(x, pp, *, block_batch=None):
    """x: (B, input_size) f32.  pp: output of prepare_dqn_params (pre-padded)."""
    f32 = jnp.float32
    B, in_size = x.shape
    out_size = pp["b4"].shape[1]

    B8 = _round_up(B, 8)
    if block_batch is None:
        # One tile for typical DQN minibatches; 1024-row tiles for huge sweeps.
        # (On v7x, pass block_batch ~= round_up(cdiv(B, 2), 8) to use both TCs.)
        TB = B8 if B8 <= 2048 else 1024
    else:
        TB = _round_up(min(block_batch, B8), 8)
    B_pad = _round_up(B8, TB)

    if B_pad != B:
        xp = jnp.zeros((B_pad, in_size), f32).at[:B].set(x.astype(f32))
    else:
        xp = x.astype(f32)

    def resident(shape):
        # Weights/biases: full-array block, same block every grid step -> VMEM-resident.
        return pl.BlockSpec(shape, lambda i: (0, 0))

    out = pl.pallas_call(
        dqn_kernel,
        out_shape=jax.ShapeDtypeStruct((B_pad, out_size), f32),
        grid=(B_pad // TB,),
        in_specs=[
            pl.BlockSpec((TB, in_size), lambda i: (i, 0)),     # x tiled over batch
            resident(pp["w1"].shape), resident(pp["b1"].shape),
            resident(pp["w2"].shape), resident(pp["b2"].shape),
            resident(pp["w3"].shape), resident(pp["b3"].shape),
            resident(pp["w4"].shape), resident(pp["b4"].shape),
        ],
        out_specs=pl.BlockSpec((TB, out_size), lambda i: (i, 0)),
        compiler_params=pltpu.CompilerParams(
            dimension_semantics=("parallel",)),
    )(xp, pp["w1"], pp["b1"], pp["w2"], pp["b2"],
      pp["w3"], pp["b3"], pp["w4"], pp["b4"])

    return out if B_pad == B else out[:B]


def xavier_uniform(key, fan_in, fan_out):
    # Matches nn.init.xavier_uniform_ (gain=1). PyTorch weight is (out, in);
    # generate that way then transpose to (in, out) so the kernel does y = x @ W.
    bound = jnp.sqrt(6.0 / (fan_in + fan_out))
    w = jax.random.uniform(key, (fan_out, fan_in), jnp.float32, -bound, bound)
    return w.T


def linear_bias(key, fan_in, fan_out):
    # Matches PyTorch nn.Linear default bias init: U(-1/sqrt(fan_in), 1/sqrt(fan_in)).
    bound = 1.0 / jnp.sqrt(jnp.float32(fan_in))
    return jax.random.uniform(key, (1, fan_out), jnp.float32, -bound, bound)


def init_dqn_params(key, input_size, output_size, h_size=64):
    keys = jax.random.split(key, 8)
    return {
        "w1": xavier_uniform(keys[0], input_size, h_size),
        "b1": linear_bias(keys[1], input_size, h_size),
        "w2": xavier_uniform(keys[2], h_size, h_size),
        "b2": linear_bias(keys[3], h_size, h_size),
        "w3": xavier_uniform(keys[4], h_size, h_size),
        "b3": linear_bias(keys[5], h_size, h_size),
        "w4": xavier_uniform(keys[6], h_size, output_size),
        "b4": linear_bias(keys[7], h_size, output_size),
    }


def dqn_reference(x, p):
    """Pure-JAX f32 reference (unpadded) for correctness check."""
    h = jnp.maximum(x @ p["w1"] + p["b1"], 0.0)
    h = jnp.maximum(h @ p["w2"] + p["b2"], 0.0)
    h = jnp.maximum(h @ p["w3"] + p["b3"], 0.0)
    return h @ p["w4"] + p["b4"]


if __name__ == "__main__":
    # CartPole: observation dim 4, action dim 2; hidden size 64 per the module.
    input_size, output_size, h_size = 4, 2, 64
    batch = 64                      # e.g. a DQN replay minibatch

    key = jax.random.PRNGKey(0)
    k_params, k_x = jax.random.split(key)
    params = init_dqn_params(k_params, input_size, output_size, h_size)
    x = jax.random.normal(k_x, (batch, input_size), jnp.float32)

    # Padding/casting runs once here, outside the hot forward path.
    padded = jax.tree_util.tree_map(jax.block_until_ready, prepare_dqn_params(params))

    fwd = jax.jit(functools.partial(dqn_forward))   # default: single batch tile
    out = jax.block_until_ready(fwd(x, padded))

    ref = dqn_reference(x, params)
    assert out.shape == (batch, output_size)
    # bf16 MXU inputs with f32 accumulation -> loosened tolerance vs f32 reference.
    assert jnp.allclose(out, ref, atol=3e-2, rtol=3e-2), "mismatch vs reference"

    print("KERNEL_OK")
</pallas_src>

<mosaic_0001>
module attributes {stable_mosaic.version = 11 : i64} {
  func.func @dqn_kernel(%arg0: i32, %arg1: memref<64x4xf32, #tpu.memory_space<vmem>>, %arg2: memref<4x128xf32, #tpu.memory_space<vmem>>, %arg3: memref<1x128xf32, #tpu.memory_space<vmem>>, %arg4: memref<128x128xbf16, #tpu.memory_space<vmem>>, %arg5: memref<1x128xf32, #tpu.memory_space<vmem>>, %arg6: memref<128x128xbf16, #tpu.memory_space<vmem>>, %arg7: memref<1x128xf32, #tpu.memory_space<vmem>>, %arg8: memref<128x128xbf16, #tpu.memory_space<vmem>>, %arg9: memref<1x2xf32, #tpu.memory_space<vmem>>, %arg10: memref<64x2xf32, #tpu.memory_space<vmem>>) attributes {dimension_semantics = [#tpu.dimension_semantics<parallel>], iteration_bounds = array<i64: 1>, scalar_prefetch = 0 : i64, scratch_operands = 0 : i64, tpu.core_type = #tpu.core_type<tc>, window_params = [{transform_indices = @transform_0, window_bounds = array<i64: 64, 4>}, {pipeline_mode = #tpu.pipeline_mode<synchronous>, transform_indices = @transform_1, window_bounds = array<i64: 4, 128>}, {pipeline_mode = #tpu.pipeline_mode<synchronous>, transform_indices = @transform_2, window_bounds = array<i64: 1, 128>}, {pipeline_mode = #tpu.pipeline_mode<synchronous>, transform_indices = @transform_3, window_bounds = array<i64: 128, 128>}, {pipeline_mode = #tpu.pipeline_mode<synchronous>, transform_indices = @transform_4, window_bounds = array<i64: 1, 128>}, {pipeline_mode = #tpu.pipeline_mode<synchronous>, transform_indices = @transform_5, window_bounds = array<i64: 128, 128>}, {pipeline_mode = #tpu.pipeline_mode<synchronous>, transform_indices = @transform_6, window_bounds = array<i64: 1, 128>}, {pipeline_mode = #tpu.pipeline_mode<synchronous>, transform_indices = @transform_7, window_bounds = array<i64: 128, 128>}, {pipeline_mode = #tpu.pipeline_mode<synchronous>, transform_indices = @transform_8, window_bounds = array<i64: 1, 2>}, {transform_indices = @transform_9, window_bounds = array<i64: 64, 2>}]} {
    %c0 = arith.constant 0 : index
    %c0_0 = arith.constant 0 : index
    %0 = vector.load %arg1[%c0, %c0_0] : memref<64x4xf32, #tpu.memory_space<vmem>>, vector<64x4xf32>
    %c0_1 = arith.constant 0 : index
    %c0_2 = arith.constant 0 : index
    %1 = vector.load %arg2[%c0_1, %c0_2] : memref<4x128xf32, #tpu.memory_space<vmem>>, vector<4x128xf32>
    %c0_3 = arith.constant 0 : index
    %c0_4 = arith.constant 0 : index
    %2 = vector.load %arg3[%c0_3, %c0_4] : memref<1x128xf32, #tpu.memory_space<vmem>>, vector<1x128xf32>
    %3 = vector.extract_strided_slice %0 {offsets = [0, 0], sizes = [64, 1], strides = [1, 1]} : vector<64x4xf32> to vector<64x1xf32>
    %4 = vector.extract_strided_slice %1 {offsets = [0, 0], sizes = [1, 128], strides = [1, 1]} : vector<4x128xf32> to vector<1x128xf32>
    %5 = vector.broadcast %3 : vector<64x1xf32> to vector<64x128xf32>
    %6 = vector.broadcast %4 : vector<1x128xf32> to vector<64x128xf32>
    %7 = arith.mulf %5, %6 : vector<64x128xf32>
    %8 = vector.broadcast %2 : vector<1x128xf32> to vector<64x128xf32>
    %9 = arith.addf %8, %7 : vector<64x128xf32>
    %10 = vector.extract_strided_slice %0 {offsets = [0, 1], sizes = [64, 1], strides = [1, 1]} : vector<64x4xf32> to vector<64x1xf32>
    %11 = vector.extract_strided_slice %1 {offsets = [1, 0], sizes = [1, 128], strides = [1, 1]} : vector<4x128xf32> to vector<1x128xf32>
    %12 = vector.broadcast %10 : vector<64x1xf32> to vector<64x128xf32>
    %13 = vector.broadcast %11 : vector<1x128xf32> to vector<64x128xf32>
    %14 = arith.mulf %12, %13 : vector<64x128xf32>
    %15 = arith.addf %9, %14 : vector<64x128xf32>
    %16 = vector.extract_strided_slice %0 {offsets = [0, 2], sizes = [64, 1], strides = [1, 1]} : vector<64x4xf32> to vector<64x1xf32>
    %17 = vector.extract_strided_slice %1 {offsets = [2, 0], sizes = [1, 128], strides = [1, 1]} : vector<4x128xf32> to vector<1x128xf32>
    %18 = vector.broadcast %16 : vector<64x1xf32> to vector<64x128xf32>
    %19 = vector.broadcast %17 : vector<1x128xf32> to vector<64x128xf32>
    %20 = arith.mulf %18, %19 : vector<64x128xf32>
    %21 = arith.addf %15, %20 : vector<64x128xf32>
    %22 = vector.extract_strided_slice %0 {offsets = [0, 3], sizes = [64, 1], strides = [1, 1]} : vector<64x4xf32> to vector<64x1xf32>
    %23 = vector.extract_strided_slice %1 {offsets = [3, 0], sizes = [1, 128], strides = [1, 1]} : vector<4x128xf32> to vector<1x128xf32>
    %24 = vector.broadcast %22 : vector<64x1xf32> to vector<64x128xf32>
    %25 = vector.broadcast %23 : vector<1x128xf32> to vector<64x128xf32>
    %26 = arith.mulf %24, %25 : vector<64x128xf32>
    %27 = arith.addf %21, %26 : vector<64x128xf32>
    %cst = arith.constant 0.000000e+00 : f32
    %28 = vector.broadcast %cst : f32 to vector<64x128xf32>
    %29 = arith.maximumf %27, %28 : vector<64x128xf32>
    %30 = arith.truncf %29 : vector<64x128xf32> to vector<64x128xbf16>
    %c0_5 = arith.constant 0 : index
    %c0_6 = arith.constant 0 : index
    %31 = vector.load %arg4[%c0_5, %c0_6] : memref<128x128xbf16, #tpu.memory_space<vmem>>, vector<128x128xbf16>
    %cst_7 = arith.constant dense<0.000000e+00> : vector<64x128xf32>
    %32 = tpu.matmul %30, %31, %cst_7 {dimension_numbers = #tpu.dot_dimension_numbers<[1], [0], [0], [1], [0, 0, 1, 1], [], []>} : vector<64x128xbf16>, vector<128x128xbf16>, vector<64x128xf32> -> vector<64x128xf32>
    %c0_8 = arith.constant 0 : index
    %c0_9 = arith.constant 0 : index
    %33 = vector.load %arg5[%c0_8, %c0_9] : memref<1x128xf32, #tpu.memory_space<vmem>>, vector<1x128xf32>
    %34 = vector.broadcast %33 : vector<1x128xf32> to vector<64x128xf32>
    %35 = arith.addf %32, %34 : vector<64x128xf32>
    %cst_10 = arith.constant 0.000000e+00 : f32
    %36 = vector.broadcast %cst_10 : f32 to vector<64x128xf32>
    %37 = arith.maximumf %35, %36 : vector<64x128xf32>
    %38 = arith.truncf %37 : vector<64x128xf32> to vector<64x128xbf16>
    %c0_11 = arith.constant 0 : index
    %c0_12 = arith.constant 0 : index
    %39 = vector.load %arg6[%c0_11, %c0_12] : memref<128x128xbf16, #tpu.memory_space<vmem>>, vector<128x128xbf16>
    %cst_13 = arith.constant dense<0.000000e+00> : vector<64x128xf32>
    %40 = tpu.matmul %38, %39, %cst_13 {dimension_numbers = #tpu.dot_dimension_numbers<[1], [0], [0], [1], [0, 0, 1, 1], [], []>} : vector<64x128xbf16>, vector<128x128xbf16>, vector<64x128xf32> -> vector<64x128xf32>
    %c0_14 = arith.constant 0 : index
    %c0_15 = arith.constant 0 : index
    %41 = vector.load %arg7[%c0_14, %c0_15] : memref<1x128xf32, #tpu.memory_space<vmem>>, vector<1x128xf32>
    %42 = vector.broadcast %41 : vector<1x128xf32> to vector<64x128xf32>
    %43 = arith.addf %40, %42 : vector<64x128xf32>
    %cst_16 = arith.constant 0.000000e+00 : f32
    %44 = vector.broadcast %cst_16 : f32 to vector<64x128xf32>
    %45 = arith.maximumf %43, %44 : vector<64x128xf32>
    %46 = arith.truncf %45 : vector<64x128xf32> to vector<64x128xbf16>
    %c0_17 = arith.constant 0 : index
    %c0_18 = arith.constant 0 : index
    %47 = vector.load %arg8[%c0_17, %c0_18] : memref<128x128xbf16, #tpu.memory_space<vmem>>, vector<128x128xbf16>
    %cst_19 = arith.constant dense<0.000000e+00> : vector<64x128xf32>
    %48 = tpu.matmul %46, %47, %cst_19 {dimension_numbers = #tpu.dot_dimension_numbers<[1], [0], [0], [1], [0, 0, 1, 1], [], []>} : vector<64x128xbf16>, vector<128x128xbf16>, vector<64x128xf32> -> vector<64x128xf32>
    %49 = vector.extract_strided_slice %48 {offsets = [0, 0], sizes = [64, 2], strides = [1, 1]} : vector<64x128xf32> to vector<64x2xf32>
    %c0_20 = arith.constant 0 : index
    %c0_21 = arith.constant 0 : index
    %50 = vector.load %arg9[%c0_20, %c0_21] : memref<1x2xf32, #tpu.memory_space<vmem>>, vector<1x2xf32>
    %51 = vector.broadcast %50 : vector<1x2xf32> to vector<64x2xf32>
    %52 = arith.addf %49, %51 : vector<64x2xf32>
    %c0_22 = arith.constant 0 : index
    %c0_23 = arith.constant 0 : index
    %53 = vector.load %arg10[%c0_22, %c0_23] : memref<64x2xf32, #tpu.memory_space<vmem>>, vector<64x2xf32>
    tpu.vector_store %arg10[%c0_22, %c0_23], %52 {strides = array<i32>} : memref<64x2xf32, #tpu.memory_space<vmem>>, vector<64x2xf32>,
    return
  }
  func.func @transform_0(%arg0: i32) -> (i32, i32) {
    %c0_i32 = arith.constant 0 : i32
    %c0_i32_0 = arith.constant 0 : i32
    return %arg0, %c0_i32 : i32, i32
  }
  func.func @transform_1(%arg0: i32) -> (i32, i32) {
    %c0_i32 = arith.constant 0 : i32
    %c0_i32_0 = arith.constant 0 : i32
    %c0_i32_1 = arith.constant 0 : i32
    return %c0_i32, %c0_i32_0 : i32, i32
  }
  func.func @transform_2(%arg0: i32) -> (i32, i32) {
    %c0_i32 = arith.constant 0 : i32
    %c0_i32_0 = arith.constant 0 : i32
    %c0_i32_1 = arith.constant 0 : i32
    return %c0_i32, %c0_i32_0 : i32, i32
  }
  func.func @transform_3(%arg0: i32) -> (i32, i32) {
    %c0_i32 = arith.constant 0 : i32
    %c0_i32_0 = arith.constant 0 : i32
    %c0_i32_1 = arith.constant 0 : i32
    return %c0_i32, %c0_i32_0 : i32, i32
  }
  func.func @transform_4(%arg0: i32) -> (i32, i32) {
    %c0_i32 = arith.constant 0 : i32
    %c0_i32_0 = arith.constant 0 : i32
    %c0_i32_1 = arith.constant 0 : i32
    return %c0_i32, %c0_i32_0 : i32, i32
  }
  func.func @transform_5(%arg0: i32) -> (i32, i32) {
    %c0_i32 = arith.constant 0 : i32
    %c0_i32_0 = arith.constant 0 : i32
    %c0_i32_1 = arith.constant 0 : i32
    return %c0_i32, %c0_i32_0 : i32, i32
  }
  func.func @transform_6(%arg0: i32) -> (i32, i32) {
    %c0_i32 = arith.constant 0 : i32
    %c0_i32_0 = arith.constant 0 : i32
    %c0_i32_1 = arith.constant 0 : i32
    return %c0_i32, %c0_i32_0 : i32, i32
  }
  func.func @transform_7(%arg0: i32) -> (i32, i32) {
    %c0_i32 = arith.constant 0 : i32
    %c0_i32_0 = arith.constant 0 : i32
    %c0_i32_1 = arith.constant 0 : i32
    return %c0_i32, %c0_i32_0 : i32, i32
  }
  func.func @transform_8(%arg0: i32) -> (i32, i32) {
    %c0_i32 = arith.constant 0 : i32
    %c0_i32_0 = arith.constant 0 : i32
    %c0_i32_1 = arith.constant 0 : i32
    return %c0_i32, %c0_i32_0 : i32, i32
  }
  func.func @transform_9(%arg0: i32) -> (i32, i32) {
    %c0_i32 = arith.constant 0 : i32
    %c0_i32_0 = arith.constant 0 : i32
    return %arg0, %c0_i32 : i32, i32
  }
}

</mosaic_0001>

<bundles_post_ra>
// kernel: dqn_forward.1
= control target key start
LH: loop header
LB: loop body
LE: loop exit
PB: predicated region body
PF: predicated region fallthrough
CT: control target
= control target key end

     0   :  { %14 = vsyncpa [#allocation3], 0  ;;  %s1246_s0 = inlined_call_operand.vmem [shape: f32[64,4], index: 0, kind: input, shape index: {}]   ;;  %s1247_s1 = inlined_call_operand.vmem [shape: f32[4,128], index: 1, kind: input, shape index: {}]   ;;  %s1248_s2 = inlined_call_operand.vmem [shape: f32[1,128], index: 2, kind: input, shape index: {}]   ;;  %s1249_s3 = inlined_call_operand.vmem [shape: bf16[128,128], index: 3, kind: input, shape index: {}]   ;;  %s1250_s4 = inlined_call_operand.vmem [shape: f32[1,128], index: 4, kind: input, shape index: {}]   ;;  %s1251_s5 = inlined_call_operand.hbm [shape: bf16[128,128], index: 5, kind: input, shape index: {}]   ;;  %s1252_s6 = inlined_call_operand.vmem [shape: f32[1,128], index: 6, kind: input, shape index: {}]   ;;  %s1253_s7 = inlined_call_operand.hbm [shape: bf16[128,128], index: 7, kind: input, shape index: {}]   ;;  %s1254_s8 = inlined_call_operand.vmem [shape: f32[1,2], index: 8, kind: input, shape index: {}]   ;;  %s1255_s9 = inlined_call_operand.vmem [shape: f32[64,2], index: 9, kind: output, shape index: {}]  }
   0x1   :  { %15 = vsyncpa [#allocation5], 0  ;;  %s1004_s30 = smov [#allocation2]   ;;  %s956_s13 = scalar_lea.hbm %s1251_s5, 1024 }
   0x2   :  { %s31_s10 = sshll.u32 %s1004_s30, 4  ;;  %p957_p0 = scmp.ne.s32.totalorder %s1251_s5, %s956_s13  ;;  %s32_s10 = int_to_ptr.vmem [resolvable:$true] %s31_s10 }
   0x3   :  { %p960_p1 = scmp.lt.u32.totalorder %s956_s13, %s1251_s5 }
   0x5   :  { %p962_p2 = pnand %p960_p1, %p957_p0 }
   0x7   :  { %965 = shalt.err (!%p962_p2)
}
   0x8   :  { %s966_s18 = scalar_lea.vmem %s32_s10, 1024  ;;  %p971_p4 = scmp.lt.s32.totalorder %s32_s10, %s32_s10 }
   0x9   :  { %p967_p3 = scmp.ne.s32.totalorder %s32_s10, %s966_s18  ;;  %p972_p5 = scmp.lt.s32.totalorder %s966_s18, %s966_s18 }
   0xb   :  { %p973_p6 = por %p972_p5, %p971_p4 }
   0xd   :  { %p974_p7 = pnand %p973_p6, %p967_p3 }
   0xf   :  { %977 = shalt.err (!%p974_p7)
}
  0x10   :  { %s1005_s19 = smov 64   ;;  %s1006_s20 = smov 4  }
  0x11   :  { %37 = dma.hbm_to_vmem [thread:$0]  %s1251_s5, 1024, %s32_s10, [#allocation3], %s1005_s19, %s1005_s19, %s1006_s20  }
  0x12   :  { %s1007_s23 = smov [#allocation4]   ;;  %s978_s27 = scalar_lea.hbm %s1253_s7, 1024 }
  0x13   :  { %s45_s24 = sshll.u32 %s1007_s23, 4  ;;  %p979_p8 = scmp.ne.s32.totalorder %s1253_s7, %s978_s27  ;;  %s46_s24 = int_to_ptr.vmem [resolvable:$true] %s45_s24 }
  0x14   :  { %p982_p9 = scmp.lt.u32.totalorder %s978_s27, %s1253_s7 }
  0x16   :  { %p984_p10 = pnand %p982_p9, %p979_p8 }
  0x18   :  { %987 = shalt.err (!%p984_p10)
}
  0x19   :  { %s988_s12 = scalar_lea.vmem %s46_s24, 1024  ;;  %p993_p12 = scmp.lt.s32.totalorder %s46_s24, %s46_s24 }
  0x1a   :  { %p989_p11 = scmp.ne.s32.totalorder %s46_s24, %s988_s12  ;;  %p994_p13 = scmp.lt.s32.totalorder %s988_s12, %s988_s12 }
  0x1c   :  { %p995_p0 = por %p994_p13, %p993_p12 }
  0x1e   :  { %p996_p1 = pnand %p995_p0, %p989_p11 }
  0x20   :  { %999 = shalt.err (!%p996_p1)
}
  0x21   :  { %51 = dma.hbm_to_vmem [thread:$0]  %s1253_s7, 1024, %s46_s24, [#allocation5], %s1005_s19, %s1005_s19, %s1006_s20  }
  0x22   :  { %1000 = dma.done.wait [#allocation3], 1024  }
  0x23   :  { %1001 = vsyncadd [#allocation3], 4294966272 }
  0x24   :  { %1002 = dma.done.wait [#allocation5], 1024  }
  0x25   :  { %1003 = vsyncadd [#allocation5], 4294966272  ;;  %v1008_v0 = vmov 0   ;;  %v63_v1 = vld [vmem:[%s1246_s0 + $0x10] sm:$0xff]  ;;  %v61_v2 = vld [vmem:[%s1246_s0] sm:$0xff]  ;;  %v1009_v6 = vmov 1   ;;  %v111_v32 = vlaneseq }
  0x26   :  { %921 = vset.pattern.permute.xlu1 %v1008_v0  ;;  %920 = vset.pattern.permute.xlu0 %v1008_v0  ;;  %v64_v3 = vld [vmem:[%s1246_s0 + $0x18] sm:$0xff]  ;;  %v62_v4 = vld [vmem:[%s1246_s0 + $0x8] sm:$0xff]  ;;  %v65_v7 = vld [vmem:[%s1246_s0 + $0x20] sm:$0xff]  ;;  %v1010_v8 = vmov 2   ;;  %v1011_v14 = vmov 3   ;;  %vm745_vm0 = vcmask 15360  }
  0x27   :  { %83 = vperm.xlu1 %921, %v63_v1   ;;  %73 = vperm.xlu0 %920, %v61_v2   ;;  %v1101_v5 = vld [vmem:[%s1246_s0 + $0x28] sm:$0xff]  ;;  %v932_v9 = vld [vmem:[%s1249_s3] sm:$0xff]   ;;  %v68_v11 = vld [vmem:[%s1246_s0 + $0x38] sm:$0xff]  ;;  %v112_v35 = vshrl.u32 %v111_v32, 7 }
  0x28   :  { %824 = vmatprep.subr.bf16.mxu0 %v932_v9  ;;  %v933_v10 = vld [vmem:[%s1249_s3 + $0x8] sm:$0xff]   ;;  %v934_v12 = vld [vmem:[%s1249_s3 + $0x10] sm:$0xff]   ;;  %v935_v13 = vld [vmem:[%s1249_s3 + $0x18] sm:$0xff]  }
  0x29   :  { %825 = vmatpush3.bf16.msra.mxu0 %v932_v9  ;;  %v936_v15 = vld [vmem:[%s1249_s3 + $0x20] sm:$0xff]   ;;  %v937_v16 = vld [vmem:[%s1249_s3 + $0x28] sm:$0xff]   ;;  %v67_v17 = vld [vmem:[%s1246_s0 + $0x30] sm:$0xff]  ;;  %v113_v38 = vsub.s32 0, %v112_v35  ;;  %v171_v41 = vsub.s32 1, %v112_v35  ;;  %v223_v47 = vsub.s32 2, %v112_v35 }
  0x2a   :  { %826 = vmatprep.subr.bf16.mxu0 %v933_v10  ;;  %v938_v18 = vld [vmem:[%s1249_s3 + $0x30] sm:$0xff]   ;;  %v939_v19 = vld [vmem:[%s1249_s3 + $0x38] sm:$0xff]   ;;  %v940_v20 = vld [vmem:[#allocation2] sm:$0xff]   ;;  %v275_v50 = vsub.s32 3, %v112_v35 }
  0x2b   :  { %88 = vperm.xlu1 %921, %v64_v3   ;;  %78 = vperm.xlu0 %920, %v62_v4   ;;  %v941_v21 = vld [vmem:[#allocation2 + $0x8] sm:$0xff]   ;;  %v942_v22 = vld [vmem:[#allocation2 + $0x10] sm:$0xff]   ;;  %v943_v23 = vld [vmem:[#allocation2 + $0x18] sm:$0xff]  }
  0x2c   :  { %848 = vmatprep.subr.bf16.mxu1 %v940_v20  ;;  %v944_v24 = vld [vmem:[#allocation2 + $0x20] sm:$0xff]   ;;  %v945_v25 = vld [vmem:[#allocation2 + $0x28] sm:$0xff]  }
  0x2d   :  { %827 = vmatpush3.bf16.msra.mxu0 %v933_v10  ;;  %849 = vmatpush3.bf16.msra.mxu1 %v940_v20  ;;  %v69_v39 = vld [vmem:[%s1247_s1] sm:$0xf] }
  0x2e   :  { %828 = vmatprep.subr.bf16.mxu0 %v934_v12  ;;  %850 = vmatprep.subr.bf16.mxu1 %v941_v21  ;;  %v1147_v43 = vrot.slane %v69_v39, %v113_v38  ;;  %v1152_v46 = vrot.slane %v69_v39, %v171_v41  ;;  %v1158_v51 = vld [vmem:[%s1248_s2] ss:$0 sm:$0xff]  ;;  %v1162_v54 = vrot.slane %v69_v39, %v223_v47 }
  0x2f   :  { %922 = vset.pattern.permute.xlu1 %v1009_v6  ;;  %98 = vperm.xlu0 %920, %v1101_v5   ;;  %v1167_v60 = vrot.slane %v69_v39, %v275_v50 }
  0x30   :  { %142 = vperm.xlu1 %922, %v62_v4  }
  0x31   :  { %829 = vmatpush3.bf16.msra.mxu0 %v934_v12  ;;  %851 = vmatpush3.bf16.msra.mxu1 %v941_v21 }
  0x32   :  { %830 = vmatprep.subr.bf16.mxu0 %v935_v13  ;;  %852 = vmatprep.subr.bf16.mxu1 %v942_v22 }
  0x33   :  { %926 = vset.pattern.permute.xlu0 %v1009_v6 }
  0x34   :  { %146 = vperm.xlu1 %922, %v63_v1   ;;  %138 = vperm.xlu0 %926, %v61_v2  }
  0x35   :  { %831 = vmatpush3.bf16.msra.mxu0 %v935_v13  ;;  %853 = vmatpush3.bf16.msra.mxu1 %v942_v22 }
  0x36   :  { %832 = vmatprep.subr.bf16.mxu0 %v936_v15  ;;  %854 = vmatprep.subr.bf16.mxu1 %v943_v23 }
  0x38   :  { %923 = vset.pattern.permute.xlu1 %v1010_v8  ;;  %150 = vperm.xlu0 %926, %v64_v3  }
  0x39   :  { %190 = vperm.xlu1 %923, %v61_v2   ;;  %833 = vmatpush3.bf16.msra.mxu0 %v936_v15 }
  0x3a   :  { %834 = vmatprep.subr.bf16.mxu0 %v937_v16  ;;  %855 = vmatpush3.bf16.msra.mxu1 %v943_v23 }
  0x3b   :  { %856 = vmatprep.subr.bf16.mxu1 %v944_v24 }
  0x3c   :  { %154 = vperm.xlu0 %926, %v65_v7  }
  0x3d   :  { %198 = vperm.xlu1 %923, %v63_v1   ;;  %835 = vmatpush3.bf16.msra.mxu0 %v937_v16 }
  0x3e   :  { %836 = vmatprep.subr.bf16.mxu0 %v938_v18  ;;  %857 = vmatpush3.bf16.msra.mxu1 %v944_v24 }
  0x3f   :  { %858 = vmatprep.subr.bf16.mxu1 %v945_v25 }
  0x40   :  { %166 = vperm.xlu0 %926, %v68_v11  }
  0x41   :  { %202 = vperm.xlu1 %923, %v64_v3   ;;  %837 = vmatpush3.bf16.msra.mxu0 %v938_v18 }
  0x42   :  { %838 = vmatprep.subr.bf16.mxu0 %v939_v19  ;;  %859 = vmatpush3.bf16.msra.mxu1 %v945_v25 }
  0x44   :  { %928 = vset.pattern.permute.xlu0 %v1010_v8 }
  0x45   :  { %924 = vset.pattern.permute.xlu1 %v1011_v14  ;;  %194 = vperm.xlu0 %928, %v62_v4  }
  0x46   :  { %246 = vperm.xlu1 %924, %v62_v4   ;;  %839 = vmatpush3.bf16.msra.mxu0 %v939_v19 }
  0x49   :  { %210 = vperm.xlu0 %928, %v1101_v5  }
  0x4a   :  { %250 = vperm.xlu1 %924, %v63_v1  }
  0x4d   :  { %930 = vset.pattern.permute.xlu0 %v1011_v14 }
  0x4e   :  { %925 = vset.pattern.permute.xlu1 %v1008_v0  ;;  %242 = vperm.xlu0 %930, %v61_v2  }
  0x4f   :  { %93 = vperm.xlu1 %925, %v65_v7  }
  0x52   :  { %254 = vperm.xlu0 %930, %v64_v3  }
  0x53   :  { %103 = vperm.xlu1 %925, %v67_v17  }
  0x56   :  { %258 = vperm.xlu0 %930, %v65_v7  }
  0x57   :  { %108 = vperm.xlu1 %925, %v68_v11  }
  0x5a   :  { %270 = vperm.xlu0 %930, %v68_v11  }
  0x5b   :  { %927 = vset.pattern.permute.xlu1 %v1009_v6 }
  0x5c   :  { %158 = vperm.xlu1 %927, %v1101_v5  }
  0x60   :  { %162 = vperm.xlu1 %927, %v67_v17  }
  0x64   :  { %929 = vset.pattern.permute.xlu1 %v1010_v8 }
  0x65   :  { %206 = vperm.xlu1 %929, %v65_v7  }
  0x69   :  { %214 = vperm.xlu1 %929, %v67_v17  }
  0x6d   :  { %218 = vperm.xlu1 %929, %v68_v11  }
  0x71   :  { %931 = vset.pattern.permute.xlu1 %v1011_v14 }
  0x72   :  { %262 = vperm.xlu1 %931, %v1101_v5  }
  0x76   :  { %266 = vperm.xlu1 %931, %v67_v17  }
  0xa6   :  { %v84_v26 = vpop.permute.xlu1 %83  ;;  %v74_v27 = vpop.permute.xlu0 %73 }
  0xa7   :  { %v115_v49 = vmul.f32 %v1147_v43, %v74_v27  ;;  %v117_v61 = vmul.f32 %v1147_v43, %v84_v26 }
  0xa9   :  { %v129_v57 = vadd.f32 %v1158_v51, %v115_v49  ;;  %v131_v7 = vadd.f32 %v1158_v51, %v117_v61 }
  0xaa   :  { %v89_v28 = vpop.permute.xlu1 %88  ;;  %v79_v29 = vpop.permute.xlu0 %78 }
  0xab   :  { %v116_v45 = vmul.f32 %v1147_v43, %v79_v29  ;;  %v118_v0 = vmul.f32 %v1147_v43, %v89_v28 }
  0xad   :  { %v130_v52 = vadd.f32 %v1158_v51, %v116_v45  ;;  %v132_v10 = vadd.f32 %v1158_v51, %v118_v0 }
  0xae   :  { %v1140_v30 = vpop.permute.xlu0 %98 }
  0xaf   :  { %v143_v31 = vpop.permute.xlu1 %142  ;;  %v120_v45 = vmul.f32 %v1147_v43, %v1140_v30 }
  0xb0   :  { %v174_v53 = vmul.f32 %v1152_v46, %v143_v31 }
  0xb2   :  { %v182_v62 = vadd.f32 %v174_v53, %v130_v52 }
  0xb3   :  { %v147_v33 = vpop.permute.xlu1 %146  ;;  %v139_v34 = vpop.permute.xlu0 %138 }
  0xb4   :  { %v173_v58 = vmul.f32 %v1152_v46, %v139_v34  ;;  %v175_v1 = vmul.f32 %v1152_v46, %v147_v33 }
  0xb6   :  { %v181_v3 = vadd.f32 %v173_v58, %v129_v57  ;;  %v183_v11 = vadd.f32 %v175_v1, %v131_v7 }
  0xb7   :  { %v151_v36 = vpop.permute.xlu0 %150 }
  0xb8   :  { %v191_v37 = vpop.permute.xlu1 %190  ;;  %v176_v8 = vmul.f32 %v1152_v46, %v151_v36 }
  0xb9   :  { %v225_v4 = vmul.f32 %v1162_v54, %v191_v37 }
  0xba   :  { %v184_v19 = vadd.f32 %v176_v8, %v132_v10 }
  0xbb   :  { %v1145_v40 = vpop.permute.xlu0 %154  ;;  %v233_v14 = vadd.f32 %v225_v4, %v181_v3 }
  0xbc   :  { %v199_v42 = vpop.permute.xlu1 %198  ;;  %v177_v41 = vmul.f32 %v1152_v46, %v1145_v40 }
  0xbd   :  { %v227_v9 = vmul.f32 %v1162_v54, %v199_v42 }
  0xbf   :  { %v1149_v44 = vpop.permute.xlu0 %166  ;;  %v235_v20 = vadd.f32 %v227_v9, %v183_v11 }
  0xc0   :  { %v203_v48 = vpop.permute.xlu1 %202  ;;  %v180_v30 = vmul.f32 %v1152_v46, %v1149_v44 }
  0xc1   :  { %v228_v12 = vmul.f32 %v1162_v54, %v203_v48 }
  0xc3   :  { %v236_v22 = vadd.f32 %v228_v12, %v184_v19  ;;  %v946_v19 = vld [vmem:[#allocation2 + $0x30] sm:$0xff]  }
  0xc4   :  { %v195_v55 = vpop.permute.xlu0 %194  ;;  %860 = vmatprep.subr.bf16.mxu1 %v946_v19 }
  0xc5   :  { %v247_v56 = vpop.permute.xlu1 %246  ;;  %v226_v59 = vmul.f32 %v1162_v54, %v195_v55  ;;  %v134_v55 = vadd.f32 %v1158_v51, %v120_v45  ;;  %861 = vmatpush3.bf16.msra.mxu1 %v946_v19 }
  0xc6   :  { %v278_v6 = vmul.f32 %v1167_v60, %v247_v56 }
  0xc7   :  { %v234_v5 = vadd.f32 %v226_v59, %v182_v62 }
  0xc8   :  { %v211_v63 = vpop.permute.xlu0 %210 }
  0xc9   :  { %v251_v2 = vpop.permute.xlu1 %250  ;;  %v286_v18 = vadd.f32 %v278_v6, %v234_v5  ;;  %v230_v61 = vmul.f32 %v1162_v54, %v211_v63 }
  0xca   :  { %v279_v15 = vmul.f32 %v1167_v60, %v251_v2 }
  0xcb   :  { %v294_v28 = vmax.f32 %v286_v18, 0.0 }
  0xcc   :  { %v287_v24 = vadd.f32 %v279_v15, %v235_v20  ;;  %v947_v20 = vld [vmem:[#allocation2 + $0x38] sm:$0xff]  }
  0xcd   :  { %v243_v13 = vpop.permute.xlu0 %242  ;;  %862 = vmatprep.subr.bf16.mxu1 %v947_v20 }
  0xce   :  { %v277_v16 = vmul.f32 %v1167_v60, %v243_v13  ;;  %v94_v17 = vpop.permute.xlu1 %93  ;;  %v295_v32 = vmax.f32 %v287_v24, 0.0  ;;  %863 = vmatpush3.bf16.msra.mxu1 %v947_v20  ;;  %v952_v24 = vld [vmem:[#allocation4 + $0x20] sm:$0xff]  }
  0xcf   :  { %v119_v38 = vmul.f32 %v1147_v43, %v94_v17 }
  0xd0   :  { %v285_v21 = vadd.f32 %v277_v16, %v233_v14 }
  0xd1   :  { %v255_v23 = vpop.permute.xlu0 %254  ;;  %v133_v42 = vadd.f32 %v1158_v51, %v119_v38 }
  0xd2   :  { %v280_v25 = vmul.f32 %v1167_v60, %v255_v23  ;;  %v104_v26 = vpop.permute.xlu1 %103  ;;  %v293_v27 = vmax.f32 %v285_v21, 0.0  ;;  %v948_v21 = vld [vmem:[#allocation4] sm:$0xff]   ;;  %v951_v23 = vld [vmem:[#allocation4 + $0x18] sm:$0xff]  }
  0xd3   :  { %v185_v53 = vadd.f32 %v177_v41, %v133_v42  ;;  %v121_v40 = vmul.f32 %v1147_v43, %v104_v26  ;;  %872 = vmatprep.subr.bf16.mxu0 %v948_v21  ;;  %896 = vmatprep.subr.bf16.mxu1 %v948_v21  ;;  %v761_v26 = vld [vmem:[%s1250_s4] ss:$0 sm:$0xff] }
  0xd4   :  { %v288_v29 = vadd.f32 %v280_v25, %v236_v22  ;;  %v301_v31 = vpack.c.bf16 %v294_v28, %v293_v27  ;;  %v949_v22 = vld [vmem:[#allocation4 + $0x8] sm:$0xff]  }
  0xd5   :  { %v259_v52 = vpop.permute.xlu0 %258  ;;  %v135_v3 = vadd.f32 %v1158_v51, %v121_v40  ;;  %v953_v25 = vld [vmem:[#allocation4 + $0x28] sm:$0xff]  }
  0xd6   :  { %v296_v33 = vmax.f32 %v288_v29, 0.0  ;;  %v109_v34 = vpop.permute.xlu1 %108  ;;  %840 = vmatprep.mubr.bf16.mxu0 %v301_v31  ;;  %v281_v59 = vmul.f32 %v1167_v60, %v259_v52 }
  0xd7   :  { %v122_v47 = vmul.f32 %v1147_v43, %v109_v34 }
  0xd8   :  { %v302_v35 = vpack.c.bf16 %v296_v33, %v295_v32 }
  0xd9   :  { %v136_v56 = vadd.f32 %v1158_v51, %v122_v47  ;;  %v271_v5 = vpop.permute.xlu0 %270 }
  0xda   :  { %841 = vmatmul.mubr.bf16.vlgmr.msra.gmra.mrb[0].mxu0 %v302_v35  ;;  %v284_v63 = vmul.f32 %v1167_v60, %v271_v5 }
  0xdb   :  { %v159_v36 = vpop.permute.xlu1 %158  ;;  %v188_v2 = vadd.f32 %v180_v30, %v136_v56  ;;  %873 = vmatpush3.bf16.msra.mxu0 %v948_v21 }
  0xdc   :  { %v178_v50 = vmul.f32 %v1152_v46, %v159_v36  ;;  %874 = vmatprep.subr.bf16.mxu0 %v949_v22 }
  0xde   :  { %v186_v62 = vadd.f32 %v178_v50, %v134_v55 }
  0xdf   :  { %v163_v37 = vpop.permute.xlu1 %162  ;;  %875 = vmatpush3.bf16.msra.mxu0 %v949_v22 }
  0xe0   :  { %v179_v1 = vmul.f32 %v1152_v46, %v163_v37  ;;  %v238_v8 = vadd.f32 %v230_v61, %v186_v62  ;;  %v954_v61 = vld [vmem:[#allocation4 + $0x30] sm:$0xff]   ;;  %v955_v62 = vld [vmem:[#allocation4 + $0x38] sm:$0xff]  }
  0xe2   :  { %v187_v44 = vadd.f32 %v179_v1, %v135_v3 }
  0xe4   :  { %v207_v39 = vpop.permute.xlu1 %206 }
  0xe5   :  { %v229_v49 = vmul.f32 %v1162_v54, %v207_v39 }
  0xe7   :  { %v237_v58 = vadd.f32 %v229_v49, %v185_v53 }
  0xe8   :  { %v215_v48 = vpop.permute.xlu1 %214 }
  0xe9   :  { %v289_v4 = vadd.f32 %v281_v59, %v237_v58  ;;  %v231_v43 = vmul.f32 %v1162_v54, %v215_v48 }
  0xeb   :  { %v297_v11 = vmax.f32 %v289_v4, 0.0  ;;  %v239_v13 = vadd.f32 %v231_v43, %v187_v44 }
  0xec   :  { %v219_v57 = vpop.permute.xlu1 %218 }
  0xed   :  { %v232_v0 = vmul.f32 %v1162_v54, %v219_v57 }
  0xef   :  { %v240_v7 = vadd.f32 %v232_v0, %v188_v2  ;;  %v770_v0 = vld [vmem:[%s1252_s6] ss:$0 sm:$0xff] }
  0xf1   :  { %v263_v6 = vpop.permute.xlu1 %262  ;;  %v292_v46 = vadd.f32 %v284_v63, %v240_v7 }
  0xf2   :  { %v282_v9 = vmul.f32 %v1167_v60, %v263_v6 }
  0xf3   :  { %v300_v17 = vmax.f32 %v292_v46, 0.0 }
  0xf4   :  { %v290_v10 = vadd.f32 %v282_v9, %v238_v8 }
  0xf5   :  { %v267_v12 = vpop.permute.xlu1 %266 }
  0xf6   :  { %v298_v14 = vmax.f32 %v290_v10, 0.0  ;;  %v283_v51 = vmul.f32 %v1167_v60, %v267_v12  ;;  %v950_v60 = vld [vmem:[#allocation4 + $0x10] sm:$0xff]  }
  0xf7   :  { %876 = vmatprep.subr.bf16.mxu0 %v950_v60 }
  0xf8   :  { %v291_v15 = vadd.f32 %v283_v51, %v239_v13  ;;  %v303_v16 = vpack.c.bf16 %v298_v14, %v297_v11  ;;  %877 = vmatpush3.bf16.msra.mxu0 %v950_v60 }
  0xf9   :  { %878 = vmatprep.subr.bf16.mxu0 %v951_v23 }
  0xfa   :  { %v299_v18 = vmax.f32 %v291_v15, 0.0  ;;  %844 = vmatprep.mubr.bf16.mxu0 %v303_v16 }
  0xfc   :  { %v304_v54 = vpack.c.bf16 %v300_v17, %v299_v18  ;;  %879 = vmatpush3.bf16.msra.mxu0 %v951_v23 }
  0xfd   :  { %880 = vmatprep.subr.bf16.mxu0 %v952_v24 }
  0xfe   :  { %845 = vmatmul.mubr.bf16.gmra.mrb[4].mxu0 %v304_v54 }
 0x100   :  { %881 = vmatpush3.bf16.msra.mxu0 %v952_v24 }
 0x101   :  { %882 = vmatprep.subr.bf16.mxu0 %v953_v25 }
 0x104   :  { %883 = vmatpush3.bf16.msra.mxu0 %v953_v25 }
 0x105   :  { %884 = vmatprep.subr.bf16.mxu0 %v954_v61 }
 0x108   :  { %885 = vmatpush3.bf16.msra.mxu0 %v954_v61 }
 0x109   :  { %886 = vmatprep.subr.bf16.mxu0 %v955_v62 }
 0x10c   :  { %887 = vmatpush3.bf16.msra.mxu0 %v955_v62 }
 0x1ad   :  { %v842_v27 = vpop.f32.mrb[0].mxu0 }
 0x1ae   :  { %v419_v28 = vadd.f32 %v842_v27, %v761_v26  ;;  %v410_v29 = vpop.f32.mrb[1].mxu0 }
 0x1af   :  { %v411_v31 = vadd.f32 %v761_v26, %v410_v29  ;;  %v843_v32 = vpop.f32.mrb[2].mxu0 }
 0x1b0   :  { %v422_v33 = vadd.f32 %v843_v32, %v761_v26  ;;  %v413_v34 = vpop.f32.mrb[3].mxu0  ;;  %v443_v36 = vmax.f32 %v419_v28, 0.0 }
 0x1b1   :  { %v414_v35 = vadd.f32 %v761_v26, %v413_v34  ;;  %v441_v38 = vmax.f32 %v411_v31, 0.0 }
 0x1b2   :  { %v444_v37 = vmax.f32 %v422_v33, 0.0 }
 0x1b3   :  { %v442_v39 = vmax.f32 %v414_v35, 0.0 }
 0x1b4   :  { %v450_v41 = vpack.c.bf16 %v444_v37, %v443_v36 }
 0x1b5   :  { %v449_v42 = vpack.c.bf16 %v442_v39, %v441_v38 }
 0x1b7   :  { %864 = vmatprep.mubr.bf16.mxu1 %v449_v42 }
 0x1b8   :  { %865 = vmatmul.mubr.bf16.vlgmr.msra.gmra.mrb[0].mxu1 %v450_v41 }
 0x1b9   :  { %904 = vmatpush3.bf16.msra.mxu1 %v948_v21 }
 0x1ba   :  { %897 = vmatprep.subr.bf16.mxu1 %v949_v22 }
 0x1bd   :  { %905 = vmatpush3.bf16.msra.mxu1 %v949_v22 }
 0x1be   :  { %898 = vmatprep.subr.bf16.mxu1 %v950_v60 }
 0x1c1   :  { %906 = vmatpush3.bf16.msra.mxu1 %v950_v60  ;;  %v787_v60 = vld [vmem:[%s1254_s8] ss:$0 sm:$0xff] }
 0x1c2   :  { %899 = vmatprep.subr.bf16.mxu1 %v951_v23 }
 0x1c5   :  { %907 = vmatpush3.bf16.msra.mxu1 %v951_v23 }
 0x1c6   :  { %900 = vmatprep.subr.bf16.mxu1 %v952_v24 }
 0x1c9   :  { %908 = vmatpush3.bf16.msra.mxu1 %v952_v24 }
 0x1ca   :  { %901 = vmatprep.subr.bf16.mxu1 %v953_v25 }
 0x1cd   :  { %909 = vmatpush3.bf16.msra.mxu1 %v953_v25 }
 0x1ce   :  { %902 = vmatprep.subr.bf16.mxu1 %v954_v61 }
 0x1d1   :  { %v846_v45 = vpop.f32.mrb[4].mxu0  ;;  %910 = vmatpush3.bf16.msra.mxu1 %v954_v61 }
 0x1d2   :  { %v435_v47 = vadd.f32 %v846_v45, %v761_v26  ;;  %v426_v48 = vpop.f32.mrb[5].mxu0  ;;  %903 = vmatprep.subr.bf16.mxu1 %v955_v62 }
 0x1d3   :  { %v427_v49 = vadd.f32 %v761_v26, %v426_v48  ;;  %v847_v50 = vpop.f32.mrb[6].mxu0 }
 0x1d4   :  { %v438_v52 = vadd.f32 %v847_v50, %v761_v26  ;;  %v429_v53 = vpop.f32.mrb[7].mxu0  ;;  %v447_v56 = vmax.f32 %v435_v47, 0.0 }
 0x1d5   :  { %v430_v55 = vadd.f32 %v761_v26, %v429_v53  ;;  %v445_v40 = vmax.f32 %v427_v49, 0.0  ;;  %911 = vmatpush3.bf16.msra.mxu1 %v955_v62 }
 0x1d6   :  { %v448_v57 = vmax.f32 %v438_v52, 0.0 }
 0x1d7   :  { %v446_v58 = vmax.f32 %v430_v55, 0.0 }
 0x1d8   :  { %v452_v59 = vpack.c.bf16 %v448_v57, %v447_v56 }
 0x1d9   :  { %v451_v30 = vpack.c.bf16 %v446_v58, %v445_v40 }
 0x1db   :  { %868 = vmatprep.mubr.bf16.mxu1 %v451_v30 }
 0x1dc   :  { %869 = vmatmul.mubr.bf16.gmra.mrb[4].mxu1 %v452_v59 }
 0x28b   :  { %v866_v1 = vpop.f32.mrb[0].mxu1 }
 0x28c   :  { %v567_v2 = vadd.f32 %v866_v1, %v770_v0  ;;  %v558_v3 = vpop.f32.mrb[1].mxu1 }
 0x28d   :  { %v559_v4 = vadd.f32 %v770_v0, %v558_v3  ;;  %v867_v5 = vpop.f32.mrb[2].mxu1 }
 0x28e   :  { %v570_v6 = vadd.f32 %v867_v5, %v770_v0  ;;  %v561_v43 = vpop.f32.mrb[3].mxu1  ;;  %v591_v8 = vmax.f32 %v567_v2, 0.0 }
 0x28f   :  { %v562_v7 = vadd.f32 %v770_v0, %v561_v43  ;;  %v589_v44 = vmax.f32 %v559_v4, 0.0 }
 0x290   :  { %v592_v9 = vmax.f32 %v570_v6, 0.0 }
 0x291   :  { %v590_v63 = vmax.f32 %v562_v7, 0.0 }
 0x292   :  { %v598_v10 = vpack.c.bf16 %v592_v9, %v591_v8 }
 0x293   :  { %v597_v11 = vpack.c.bf16 %v590_v63, %v589_v44 }
 0x295   :  { %888 = vmatprep.mubr.bf16.mxu0 %v597_v11 }
 0x296   :  { %889 = vmatmul.mubr.bf16.vlgmr.msra.gmra.mrb[8].mxu0 %v598_v10 }
 0x2af   :  { %v870_v12 = vpop.f32.mrb[4].mxu1 }
 0x2b0   :  { %v583_v13 = vadd.f32 %v870_v12, %v770_v0  ;;  %v574_v46 = vpop.f32.mrb[5].mxu1 }
 0x2b1   :  { %v575_v14 = vadd.f32 %v770_v0, %v574_v46  ;;  %v871_v51 = vpop.f32.mrb[6].mxu1 }
 0x2b2   :  { %v586_v15 = vadd.f32 %v871_v51, %v770_v0  ;;  %v577_v16 = vpop.f32.mrb[7].mxu1  ;;  %v595_v18 = vmax.f32 %v583_v13, 0.0 }
 0x2b3   :  { %v578_v17 = vadd.f32 %v770_v0, %v577_v16  ;;  %v593_v19 = vmax.f32 %v575_v14, 0.0 }
 0x2b4   :  { %v596_v54 = vmax.f32 %v586_v15, 0.0 }
 0x2b5   :  { %v594_v20 = vmax.f32 %v578_v17, 0.0 }
 0x2b6   :  { %v600_v21 = vpack.c.bf16 %v596_v54, %v595_v18 }
 0x2b7   :  { %v599_v22 = vpack.c.bf16 %v594_v20, %v593_v19 }
 0x2b9   :  { %892 = vmatprep.mubr.bf16.mxu1 %v599_v22 }
 0x2ba   :  { %893 = vmatmul.mubr.bf16.vlgmr.msra.gmra.mrb[8].mxu1 %v600_v21 }
 0x369   :  { %v890_v23 = vpop.f32.mrb[8].mxu0 }
 0x36a   :  { %v739_v24 = vadd.f32 %v890_v23, %v787_v60  ;;  %v699_v25 = vpop.f32.mrb[9].mxu0 }
 0x36b   :  { %v737_v26 = vadd.f32 %v787_v60, %v699_v25  ;;  %v891_v27 = vpop.f32.mrb[10].mxu0 }
 0x36c   :  { %748 = vst.msk [vmem:[%s1255_s9 + $0x10] sm:$0xff] %vm745_vm0, %v739_v24  ;;  %v740_v28 = vadd.f32 %v891_v27, %v787_v60  ;;  %v702_v29 = vpop.f32.mrb[11].mxu0 }
 0x36d   :  { %746 = vst.msk [vmem:[%s1255_s9] sm:$0xff] %vm745_vm0, %v737_v26  ;;  %v738_v31 = vadd.f32 %v787_v60, %v702_v29 }
 0x36e   :  { %749 = vst.msk [vmem:[%s1255_s9 + $0x18] sm:$0xff] %vm745_vm0, %v740_v28 }
 0x36f   :  { %747 = vst.msk [vmem:[%s1255_s9 + $0x8] sm:$0xff] %vm745_vm0, %v738_v31 }
 0x38d   :  { %v894_v32 = vpop.f32.mrb[8].mxu1 }
 0x38e   :  { %v743_v33 = vadd.f32 %v894_v32, %v787_v60  ;;  %v715_v34 = vpop.f32.mrb[9].mxu1 }
 0x38f   :  { %v741_v35 = vadd.f32 %v787_v60, %v715_v34  ;;  %v895_v36 = vpop.f32.mrb[10].mxu1 }
 0x390   :  { %752 = vst.msk [vmem:[%s1255_s9 + $0x30] sm:$0xff] %vm745_vm0, %v743_v33  ;;  %v744_v37 = vadd.f32 %v895_v36, %v787_v60  ;;  %v718_v38 = vpop.f32.mrb[11].mxu1 }
 0x391   :  { %750 = vst.msk [vmem:[%s1255_s9 + $0x20] sm:$0xff] %vm745_vm0, %v741_v35  ;;  %v742_v39 = vadd.f32 %v787_v60, %v718_v38 }
 0x392   :  { %753 = vst.msk [vmem:[%s1255_s9 + $0x38] sm:$0xff] %vm745_vm0, %v744_v37 }
 0x393   :  { %751 = vst.msk [vmem:[%s1255_s9 + $0x28] sm:$0xff] %vm745_vm0, %v742_v39 }
 0x394   :  { %758 = vsyncpa [#allocation3], 1 }
 0x395   :  { %759 = vsyncpa [#allocation5], 1 }

</bundles_post_ra>
